<compile_context>
chip_gen: v7x
topology: tpu7x:2x2x1
jax: 0.10.0
libtpu: 0.0.40
codegen_flags: <defaults>
</compile_context>

<pallas_src>
from functools import partial

import jax
import jax.numpy as jnp
from jax import lax
from jax.experimental import pallas as pl
from jax.experimental.pallas import tpu as pltpu

LANES = 128  # lane width of the flattened image slab


def _cdiv(a, b):
    return -(-a // b)


def _round_up(a, m):
    return _cdiv(a, m) * m


def _device_kind():
    try:
        return jax.devices()[0].device_kind.lower()
    except Exception:  # pragma: no cover - defensive; default tiling is safe
        return ""


def _sq_err_kernel(rows_valid, tile_rows, chunk_rows, acc_rows,
                   r1_ref, x1_ref, r2_ref, x2_ref, out_ref):
    # Grid queries ONLY at kernel top level (never inside pl.when / loops).
    shard = pl.program_id(0)
    step = pl.program_id(1)
    steps_per_shard = pl.num_programs(1)
    # Unclamped global block index: rows past the real array (ragged last
    # block overhang, or duplicate blocks created by index-map clamping when
    # steps don't divide evenly across shards) are masked to zero below.
    block_row0 = (shard * steps_per_shard + step) * tile_rows

    @pl.when(step == 0)
    def _init():
        out_ref[...] = jnp.zeros_like(out_ref)

    n_chunks = tile_rows // chunk_rows

    def chunk_body(c, carry):
        r0 = c * chunk_rows
        sl = pl.ds(r0, chunk_rows)
        # Upcast in-kernel so HBM traffic stays in the input dtype.
        d1 = r1_ref[sl, :].astype(jnp.float32) - x1_ref[sl, :].astype(jnp.float32)
        d2 = r2_ref[sl, :].astype(jnp.float32) - x2_ref[sl, :].astype(jnp.float32)
        sq = d1 * d1 + d2 * d2
        row_ids = block_row0 + r0 + lax.broadcasted_iota(
            jnp.int32, (chunk_rows, LANES), 0)
        sq = jnp.where(row_ids < rows_valid, sq, 0.0)
        # Fold the chunk onto (acc_rows, LANES) independent partials (pure VPU
        # adds, no cross-lane reduction in the hot loop).
        out_ref[...] += sq.reshape(chunk_rows // acc_rows, acc_rows, LANES).sum(axis=0)
        return carry

    unroll = 8 if n_chunks % 8 == 0 else (
        4 if n_chunks % 4 == 0 else (2 if n_chunks % 2 == 0 else 1))
    lax.fori_loop(0, n_chunks, chunk_body, 0, unroll=unroll)


def adavae_loss(reconstr_x1, reconstr_x2, x1, x2, mu1, mu2, log_var1, log_var2,
                beta=1.0):
    """Pallas TPU implementation of AdaVAE_Loss.forward. Returns a scalar."""
    assert reconstr_x1.shape == x1.shape and reconstr_x2.shape == x2.shape
    assert x1.size == x2.size, "the two views must have the same element count"
    total = int(x1.size)
    B = x1.shape[0]

    # ---- lane-dense (rows, 128) slab; zero-copy when total % 128 == 0 ----
    def as_slab(a):
        flat = a.reshape(-1)
        if total % LANES != 0:
            # TODO(synk): rare unaligned case still pays one HBM copy; a fully
            # copy-free path would need a manual-DMA kernel over the 1-D array.
            flat = jnp.pad(flat, (0, _round_up(total, LANES) - total))
        return flat.reshape(-1, LANES)

    slabs = [as_slab(a) for a in (reconstr_x1, x1, reconstr_x2, x2)]
    rows = slabs[0].shape[0]

    # ---- generation- and dtype-aware block sizing (in bytes, not rows) ----
    kind = _device_kind()
    is_v7 = ("v7" in kind) or ("7x" in kind)
    if is_v7:
        block_bytes = 4 << 20          # ~1.3 us/step at ~3.2 TB/s
    elif ("v5 lite" in kind) or ("v5e" in kind) or ("v5lite" in kind):
        block_bytes = 1 << 20          # stays friendly to v5e's smaller budget
    else:
        block_bytes = 2 << 20
    itemsize = max(jnp.dtype(a.dtype).itemsize for a in slabs)
    min_rows = 8 * max(1, 4 // itemsize)            # sublane packing granule
    rows_per_block = max(min_rows, (block_bytes // (LANES * itemsize)) // 64 * 64)
    tile_rows = min(rows_per_block, _round_up(rows, min_rows))
    chunk_rows = next(c for c in (64, 32, 16, 8) if tile_rows % c == 0)
    acc_rows = min(32, chunk_rows)

    steps_total = _cdiv(rows, tile_rows)
    # Megacore sharding only where it can pay off (>=2 TensorCores on v7x).
    num_shards = 2 if (is_v7 and steps_total >= 2) else 1
    steps_per_shard = _cdiv(steps_total, num_shards)
    last_block = steps_total - 1

    def img_map(c, i):
        # Clamp so no block is fully out of bounds; clamped duplicate blocks
        # are masked to zero inside the kernel.
        return (jnp.minimum(c * steps_per_shard + i, last_block), 0)

    img_spec = pl.BlockSpec((tile_rows, LANES), img_map)
    out_spec = pl.BlockSpec((None, acc_rows, LANES), lambda c, i: (c, 0, 0))

    img_bytes = sum(int(a.size) * jnp.dtype(a.dtype).itemsize for a in slabs)
    vmem_limit = int(min(48 << 20, 4 * block_bytes * 2 + (8 << 20)))

    kernel = partial(_sq_err_kernel, rows, tile_rows, chunk_rows, acc_rows)

    partials = pl.pallas_call(
        kernel,
        out_shape=jax.ShapeDtypeStruct((num_shards, acc_rows, LANES), jnp.float32),
        grid_spec=pltpu.PrefetchScalarGridSpec(
            num_scalar_prefetch=0,
            grid=(num_shards, steps_per_shard),
            in_specs=[img_spec, img_spec, img_spec, img_spec],
            out_specs=out_spec),
        compiler_params=pltpu.CompilerParams(
            dimension_semantics=("parallel", "arbitrary"),
            vmem_limit_bytes=vmem_limit),
        cost_estimate=pl.CostEstimate(
            flops=8 * total, transcendentals=0,
            bytes_accessed=img_bytes + num_shards * acc_rows * LANES * 4),
    )(*slabs)

    # MSE scaling and KLD in plain JAX (tiny; XLA fuses it for free, and beta
    # changes no longer force a kernel recompile).
    mse = jnp.sum(partials) / float(total)
    kld1 = jnp.mean(-0.5 * jnp.sum(1.0 + log_var1 - mu1 ** 2 - jnp.exp(log_var1),
                                   axis=1), axis=0)
    kld2 = jnp.mean(-0.5 * jnp.sum(1.0 + log_var2 - mu2 ** 2 - jnp.exp(log_var2),
                                   axis=1), axis=0)
    return mse + beta * (kld1 + kld2)


def _adavae_loss_ref(reconstr_x1, reconstr_x2, x1, x2, mu1, mu2,
                     log_var1, log_var2, beta=1.0):
    """Pure-JAX reference mirroring the PyTorch module exactly."""
    mse1 = jnp.mean((reconstr_x1 - x1) ** 2)
    mse2 = jnp.mean((reconstr_x2 - x2) ** 2)
    kld1 = jnp.mean(-0.5 * jnp.sum(1 + log_var1 - mu1 ** 2 - jnp.exp(log_var1),
                                   axis=1), axis=0)
    kld2 = jnp.mean(-0.5 * jnp.sum(1 + log_var2 - mu2 ** 2 - jnp.exp(log_var2),
                                   axis=1), axis=0)
    return mse1 + mse2 + beta * (kld1 + kld2)


if __name__ == "__main__":
    key = jax.random.PRNGKey(0)
    keys = jax.random.split(key, 8)

    B, C, H, W = 2, 4, 16, 16   # images NCHW
    D = 32                      # latent dim

    reconstr_x1 = jax.random.normal(keys[0], (B, C, H, W), jnp.float32)
    reconstr_x2 = jax.random.normal(keys[1], (B, C, H, W), jnp.float32)
    x1 = jax.random.normal(keys[2], (B, C, H, W), jnp.float32)
    x2 = jax.random.normal(keys[3], (B, C, H, W), jnp.float32)
    mu1 = jax.random.normal(keys[4], (B, D), jnp.float32)
    mu2 = jax.random.normal(keys[5], (B, D), jnp.float32)
    log_var1 = 0.1 * jax.random.normal(keys[6], (B, D), jnp.float32)
    log_var2 = 0.1 * jax.random.normal(keys[7], (B, D), jnp.float32)

    beta = 1.0

    loss = adavae_loss(reconstr_x1, reconstr_x2, x1, x2,
                       mu1, mu2, log_var1, log_var2, beta=beta)
    loss = jax.block_until_ready(loss)

    ref = _adavae_loss_ref(reconstr_x1, reconstr_x2, x1, x2,
                           mu1, mu2, log_var1, log_var2, beta=beta)
    ref = jax.block_until_ready(ref)

    assert jnp.allclose(loss, ref, rtol=1e-5, atol=1e-5), (loss, ref)
    print("KERNEL_OK")
</pallas_src>

<mosaic_0001>
module attributes {stable_mosaic.version = 11 : i64} {
  func.func @_sq_err_kernel(%arg0: i32, %arg1: i32, %arg2: memref<16x128xf32, #tpu.memory_space<vmem>>, %arg3: memref<16x128xf32, #tpu.memory_space<vmem>>, %arg4: memref<16x128xf32, #tpu.memory_space<vmem>>, %arg5: memref<16x128xf32, #tpu.memory_space<vmem>>, %arg6: memref<1x16x128xf32, #tpu.memory_space<vmem>>) attributes {dimension_semantics = [#tpu.dimension_semantics<parallel>, #tpu.dimension_semantics<arbitrary>], iteration_bounds = array<i64: 1, 1>, scalar_prefetch = 0 : i64, scratch_operands = 0 : i64, tpu.core_type = #tpu.core_type<tc>, window_params = [{transform_indices = @transform_0, window_bounds = array<i64: 16, 128>}, {transform_indices = @transform_1, window_bounds = array<i64: 16, 128>}, {transform_indices = @transform_2, window_bounds = array<i64: 16, 128>}, {transform_indices = @transform_3, window_bounds = array<i64: 16, 128>}, {transform_indices = @transform_4, window_bounds = array<i64: 1, 16, 128>}]} {
    %c1_i32 = arith.constant 1 : i32
    %0 = arith.muli %arg0, %c1_i32 : i32
    %1 = arith.addi %0, %arg1 : i32
    %c16_i32 = arith.constant 16 : i32
    %2 = arith.muli %1, %c16_i32 : i32
    %c0_i32 = arith.constant 0 : i32
    %3 = arith.cmpi eq, %arg1, %c0_i32 : i32
    %4 = arith.extui %3 : i1 to i32
    %c0_i32_0 = arith.constant 0 : i32
    %5 = arith.cmpi ne, %4, %c0_i32_0 : i32
    scf.if %5 {
      %cst_15 = arith.constant 0.000000e+00 : f32
      %36 = vector.broadcast %cst_15 : f32 to vector<16x128xf32>
      %c0_16 = arith.constant 0 : index
      %c0_17 = arith.constant 0 : index
      %c0_18 = arith.constant 0 : index
      %37 = vector.load %arg6[%c0_16, %c0_17, %c0_18] : memref<1x16x128xf32, #tpu.memory_space<vmem>>, vector<1x16x128xf32>
      %38 = vector.shape_cast %37 : vector<1x16x128xf32> to vector<16x128xf32>
      %39 = vector.shape_cast %36 : vector<16x128xf32> to vector<1x16x128xf32>
      tpu.vector_store %arg6[%c0_16, %c0_17, %c0_18], %39 {strides = array<i32>} : memref<1x16x128xf32, #tpu.memory_space<vmem>>, vector<1x16x128xf32>,
    } else {
    }
    %c0_i32_1 = arith.constant 0 : i32
    %c16_i32_2 = arith.constant 16 : i32
    %6 = arith.muli %c0_i32_1, %c16_i32_2 : i32
    %7 = arith.index_cast %6 : i32 to index
    %c0 = arith.constant 0 : index
    %8 = vector.load %arg2[%7, %c0] : memref<16x128xf32, #tpu.memory_space<vmem>>, vector<16x128xf32>
    %9 = arith.index_cast %6 : i32 to index
    %c0_3 = arith.constant 0 : index
    %10 = vector.load %arg3[%9, %c0_3] : memref<16x128xf32, #tpu.memory_space<vmem>>, vector<16x128xf32>
    %11 = arith.subf %8, %10 : vector<16x128xf32>
    %12 = arith.index_cast %6 : i32 to index
    %c0_4 = arith.constant 0 : index
    %13 = vector.load %arg4[%12, %c0_4] : memref<16x128xf32, #tpu.memory_space<vmem>>, vector<16x128xf32>
    %14 = arith.index_cast %6 : i32 to index
    %c0_5 = arith.constant 0 : index
    %15 = vector.load %arg5[%14, %c0_5] : memref<16x128xf32, #tpu.memory_space<vmem>>, vector<16x128xf32>
    %16 = arith.subf %13, %15 : vector<16x128xf32>
    %17 = arith.mulf %11, %11 : vector<16x128xf32>
    %18 = arith.mulf %16, %16 : vector<16x128xf32>
    %19 = arith.addf %17, %18 : vector<16x128xf32>
    %20 = arith.addi %2, %6 : i32
    %21 = tpu.iota {dimensions = array<i32: 0>} : vector<16x128xi32>
    %22 = vector.broadcast %20 : i32 to vector<16x128xi32>
    %23 = arith.addi %22, %21 : vector<16x128xi32>
    %c16_i32_6 = arith.constant 16 : i32
    %24 = vector.broadcast %c16_i32_6 : i32 to vector<16x128xi32>
    %25 = arith.cmpi slt, %23, %24 : vector<16x128xi32>
    %cst = arith.constant 0.000000e+00 : f32
    %26 = vector.broadcast %cst : f32 to vector<16x128xf32>
    %27 = arith.select %25, %19, %26 : vector<16x128xi1>, vector<16x128xf32>
    %c0_7 = arith.constant 0 : index
    %c0_8 = arith.constant 0 : index
    %c0_9 = arith.constant 0 : index
    %28 = vector.load %arg6[%c0_7, %c0_8, %c0_9] : memref<1x16x128xf32, #tpu.memory_space<vmem>>, vector<1x16x128xf32>
    %29 = vector.shape_cast %28 : vector<1x16x128xf32> to vector<16x128xf32>
    %30 = vector.shape_cast %27 : vector<16x128xf32> to vector<1x16x128xf32>
    %cst_10 = arith.constant dense<0.000000e+00> : vector<16x128xf32>
    %31 = vector.multi_reduction <add>, %30, %cst_10 [0] : vector<1x16x128xf32> to vector<16x128xf32>
    %32 = arith.addf %29, %31 : vector<16x128xf32>
    %c0_11 = arith.constant 0 : index
    %c0_12 = arith.constant 0 : index
    %c0_13 = arith.constant 0 : index
    %33 = vector.load %arg6[%c0_11, %c0_12, %c0_13] : memref<1x16x128xf32, #tpu.memory_space<vmem>>, vector<1x16x128xf32>
    %34 = vector.shape_cast %33 : vector<1x16x128xf32> to vector<16x128xf32>
    %35 = vector.shape_cast %32 : vector<16x128xf32> to vector<1x16x128xf32>
    tpu.vector_store %arg6[%c0_11, %c0_12, %c0_13], %35 {strides = array<i32>} : memref<1x16x128xf32, #tpu.memory_space<vmem>>, vector<1x16x128xf32>,
    %c1_i32_14 = arith.constant 1 : i32
    return
  }
  func.func @transform_0(%arg0: i32, %arg1: i32) -> (i32, i32) {
    %c1_i32 = arith.constant 1 : i32
    %0 = arith.muli %arg0, %c1_i32 : i32
    %1 = arith.addi %0, %arg1 : i32
    %c0_i32 = arith.constant 0 : i32
    %2 = arith.minsi %1, %c0_i32 : i32
    %c0_i32_0 = arith.constant 0 : i32
    %c0_i32_1 = arith.constant 0 : i32
    return %2, %c0_i32_0 : i32, i32
  }
  func.func @transform_1(%arg0: i32, %arg1: i32) -> (i32, i32) {
    %c1_i32 = arith.constant 1 : i32
    %0 = arith.muli %arg0, %c1_i32 : i32
    %1 = arith.addi %0, %arg1 : i32
    %c0_i32 = arith.constant 0 : i32
    %2 = arith.minsi %1, %c0_i32 : i32
    %c0_i32_0 = arith.constant 0 : i32
    %c0_i32_1 = arith.constant 0 : i32
    return %2, %c0_i32_0 : i32, i32
  }
  func.func @transform_2(%arg0: i32, %arg1: i32) -> (i32, i32) {
    %c1_i32 = arith.constant 1 : i32
    %0 = arith.muli %arg0, %c1_i32 : i32
    %1 = arith.addi %0, %arg1 : i32
    %c0_i32 = arith.constant 0 : i32
    %2 = arith.minsi %1, %c0_i32 : i32
    %c0_i32_0 = arith.constant 0 : i32
    %c0_i32_1 = arith.constant 0 : i32
    return %2, %c0_i32_0 : i32, i32
  }
  func.func @transform_3(%arg0: i32, %arg1: i32) -> (i32, i32) {
    %c1_i32 = arith.constant 1 : i32
    %0 = arith.muli %arg0, %c1_i32 : i32
    %1 = arith.addi %0, %arg1 : i32
    %c0_i32 = arith.constant 0 : i32
    %2 = arith.minsi %1, %c0_i32 : i32
    %c0_i32_0 = arith.constant 0 : i32
    %c0_i32_1 = arith.constant 0 : i32
    return %2, %c0_i32_0 : i32, i32
  }
  func.func @transform_4(%arg0: i32, %arg1: i32) -> (i32, i32, i32) {
    %c0_i32 = arith.constant 0 : i32
    %c0_i32_0 = arith.constant 0 : i32
    %c0_i32_1 = arith.constant 0 : i32
    return %arg0, %c0_i32, %c0_i32_0 : i32, i32, i32
  }
}

</mosaic_0001>

<bundles_post_ra>
// kernel: tpu_custom_call.1
= control target key start
LH: loop header
LB: loop body
LE: loop exit
PB: predicated region body
PF: predicated region fallthrough
CT: control target
= control target key end

     0   :  { %9 = vsyncpa [#allocation3], 0  ;;  %s431_s0 = inlined_call_operand.hbm [shape: f32[16,128], index: 0, kind: input, shape index: {}]   ;;  %s432_s1 = inlined_call_operand.hbm [shape: f32[16,128], index: 1, kind: input, shape index: {}]   ;;  %s433_s2 = inlined_call_operand.hbm [shape: f32[16,128], index: 2, kind: input, shape index: {}]   ;;  %s434_s3 = inlined_call_operand.hbm [shape: f32[16,128], index: 3, kind: input, shape index: {}]   ;;  %s435_s4 = inlined_call_operand.hbm [shape: f32[1,16,128], index: 4, kind: output, shape index: {}]  }
   0x1   :  { %10 = vsyncpa [#allocation6], 0 }
   0x2   :  { %11 = vsyncpa [#allocation9], 0 }
   0x3   :  { %12 = vsyncpa [#allocation4], 0  ;;  %s310_s15 = smov [#allocation5]   ;;  %s311_s17 = smov [#allocation2]  }
   0x4   :  { %s42_s16 = sshll.u32 %s310_s15, 4  ;;  %s24_s18 = sshll.u32 %s311_s17, 4  ;;  %s43_s16 = int_to_ptr.vmem [resolvable:$true] %s42_s16  ;;  %s342_s18 = int_to_ptr.vmem [resolvable:$true] %s24_s18 }
   0x5   :  { %s192_s21 = scalar_lea.hbm %s432_s1, 256 }
   0x6   :  { %p193_p0 = scmp.ne.s32.totalorder %s432_s1, %s192_s21  ;;  %p196_p1 = scmp.lt.u32.totalorder %s192_s21, %s432_s1 }
   0x8   :  { %p198_p2 = pnand %p196_p1, %p193_p0 }
   0xa   :  { %201 = shalt.err (!%p198_p2)
}
   0xb   :  { %s202_s26 = scalar_lea.vmem %s43_s16, 256  ;;  %p207_p4 = scmp.lt.s32.totalorder %s43_s16, %s43_s16 }
   0xc   :  { %p203_p3 = scmp.ne.s32.totalorder %s43_s16, %s202_s26  ;;  %p208_p5 = scmp.lt.s32.totalorder %s202_s26, %s202_s26 }
   0xe   :  { %p209_p6 = por %p208_p5, %p207_p4 }
  0x10   :  { %p210_p7 = pnand %p209_p6, %p203_p3 }
  0x12   :  { %213 = shalt.err (!%p210_p7)
}
  0x13   :  { %s312_s27 = smov 128   ;;  %s313_s28 = smov 8  }
  0x14   :  { %48 = dma.hbm_to_vmem [thread:$0]  %s432_s1, 256, %s43_s16, [#allocation6], %s312_s27, %s312_s27, %s313_s28  }
  0x15   :  { %s214_s7 = scalar_lea.hbm %s431_s0, 256 }
  0x16   :  { %p215_p8 = scmp.ne.s32.totalorder %s431_s0, %s214_s7  ;;  %p218_p9 = scmp.lt.u32.totalorder %s214_s7, %s431_s0 }
  0x18   :  { %p220_p10 = pnand %p218_p9, %p215_p8 }
  0x1a   :  { %223 = shalt.err (!%p220_p10)
}
  0x1b   :  { %s224_s12 = scalar_lea.vmem %s342_s18, 256  ;;  %p229_p12 = scmp.lt.s32.totalorder %s342_s18, %s342_s18 }
  0x1c   :  { %p225_p11 = scmp.ne.s32.totalorder %s342_s18, %s224_s12  ;;  %p230_p13 = scmp.lt.s32.totalorder %s224_s12, %s224_s12 }
  0x1e   :  { %p231_p0 = por %p230_p13, %p229_p12 }
  0x20   :  { %p232_p1 = pnand %p231_p0, %p225_p11 }
  0x22   :  { %235 = shalt.err (!%p232_p1)
}
  0x23   :  { %30 = dma.hbm_to_vmem [thread:$0]  %s431_s0, 256, %s342_s18, [#allocation3], %s312_s27, %s312_s27, %s313_s28  }
  0x24   :  { %s314_s14 = smov [#allocation7]   ;;  %s315_s16 = smov [#allocation8]  }
  0x25   :  { %s60_s15 = sshll.u32 %s314_s14, 4  ;;  %s78_s17 = sshll.u32 %s315_s16, 4  ;;  %s61_s15 = int_to_ptr.vmem [resolvable:$true] %s60_s15  ;;  %s379_s17 = int_to_ptr.vmem [resolvable:$true] %s78_s17 }
  0x26   :  { %s236_s21 = scalar_lea.hbm %s433_s2, 256 }
  0x27   :  { %p237_p2 = scmp.ne.s32.totalorder %s433_s2, %s236_s21  ;;  %p240_p3 = scmp.lt.u32.totalorder %s236_s21, %s433_s2 }
  0x29   :  { %p242_p4 = pnand %p240_p3, %p237_p2 }
  0x2b   :  { %245 = shalt.err (!%p242_p4)
}
  0x2c   :  { %s246_s0 = scalar_lea.vmem %s61_s15, 256  ;;  %p251_p6 = scmp.lt.s32.totalorder %s61_s15, %s61_s15 }
  0x2d   :  { %p247_p5 = scmp.ne.s32.totalorder %s61_s15, %s246_s0  ;;  %p252_p7 = scmp.lt.s32.totalorder %s246_s0, %s246_s0 }
  0x2f   :  { %p253_p8 = por %p252_p7, %p251_p6 }
  0x31   :  { %p254_p9 = pnand %p253_p8, %p247_p5 }
  0x33   :  { %257 = shalt.err (!%p254_p9)
}
  0x34   :  { %66 = dma.hbm_to_vmem [thread:$0]  %s433_s2, 256, %s61_s15, [#allocation6], %s312_s27, %s312_s27, %s313_s28  }
  0x35   :  { %s258_s5 = scalar_lea.hbm %s434_s3, 256 }
  0x36   :  { %p259_p10 = scmp.ne.s32.totalorder %s434_s3, %s258_s5  ;;  %p262_p11 = scmp.lt.u32.totalorder %s258_s5, %s434_s3 }
  0x38   :  { %p264_p12 = pnand %p262_p11, %p259_p10 }
  0x3a   :  { %267 = shalt.err (!%p264_p12)
}
  0x3b   :  { %s268_s10 = scalar_lea.vmem %s379_s17, 256  ;;  %p273_p0 = scmp.lt.s32.totalorder %s379_s17, %s379_s17 }
  0x3c   :  { %p269_p13 = scmp.ne.s32.totalorder %s379_s17, %s268_s10  ;;  %p274_p1 = scmp.lt.s32.totalorder %s268_s10, %s268_s10 }
  0x3e   :  { %p275_p2 = por %p274_p1, %p273_p0 }
  0x40   :  { %p276_p3 = pnand %p275_p2, %p269_p13 }
  0x42   :  { %279 = shalt.err (!%p276_p3)
}
  0x43   :  { %84 = dma.hbm_to_vmem [thread:$0]  %s434_s3, 256, %s379_s17, [#allocation9], %s312_s27, %s312_s27, %s313_s28  }
  0x44   :  { %302 = dma.done.wait [#allocation3], 256  }
  0x45   :  { %303 = vsyncadd [#allocation3], 4294967040 }
  0x46   :  { %304 = dma.done.wait [#allocation6], 512  }
  0x47   :  { %305 = vsyncadd [#allocation6], 4294966784 }
  0x48   :  { %306 = dma.done.wait [#allocation9], 256  }
  0x49   :  { %307 = vsyncadd [#allocation9], 4294967040  ;;  %v121_v0 = vld [vmem:[#allocation2] sm:$0xff]  ;;  %v123_v1 = vld [vmem:[#allocation5] sm:$0xff]  ;;  %s316_s3 = smov [#allocation10]  }
  0x4a   :  { %v127_v2 = vld [vmem:[#allocation7] sm:$0xff]  ;;  %v125_v3 = vsub.f32 %v121_v0, %v123_v1  ;;  %v129_v4 = vld [vmem:[#allocation8] sm:$0xff]  ;;  %v122_v5 = vld [vmem:[#allocation2 + $0x8] sm:$0xff]  ;;  %s162_s12 = sshll.u32 %s316_s3, 4  ;;  %s163_s12 = int_to_ptr.vmem [resolvable:$true] %s162_s12 }
  0x4b   :  { %v124_v6 = vld [vmem:[#allocation5 + $0x8] sm:$0xff]  ;;  %v131_v7 = vsub.f32 %v127_v2, %v129_v4  ;;  %v128_v9 = vld [vmem:[#allocation7 + $0x8] sm:$0xff]  ;;  %s280_s1 = scalar_lea.vmem %s163_s12, 256  ;;  %p285_p5 = scmp.lt.s32.totalorder %s163_s12, %s163_s12 }
  0x4c   :  { %v126_v8 = vsub.f32 %v122_v5, %v124_v6  ;;  %v130_v10 = vld [vmem:[#allocation8 + $0x8] sm:$0xff]  ;;  %v133_v11 = vmul.f32 %v125_v3, %v125_v3  ;;  %p281_p4 = scmp.ne.s32.totalorder %s163_s12, %s280_s1  ;;  %p286_p6 = scmp.lt.s32.totalorder %s280_s1, %s280_s1 }
  0x4d   :  { %v132_v12 = vsub.f32 %v128_v9, %v130_v10  ;;  %v135_v13 = vmul.f32 %v131_v7, %v131_v7 }
  0x4e   :  { %v134_v14 = vmul.f32 %v126_v8, %v126_v8  ;;  %p287_p7 = por %p286_p6, %p285_p5 }
  0x4f   :  { %v136_v15 = vmul.f32 %v132_v12, %v132_v12  ;;  %v137_v16 = vadd.f32 %v135_v13, %v133_v11 }
  0x50   :  { %p288_p8 = pnand %p287_p7, %p281_p4 }
  0x51   :  { %v138_v17 = vadd.f32 %v136_v15, %v134_v14  ;;  %155 = vst [vmem:[#allocation10] sm:$0xff] %v137_v16 }
  0x53   :  { %156 = vst [vmem:[#allocation10 + $0x8] sm:$0xff] %v138_v17 }
  0x54   :  { %291 = shalt.err (!%p288_p8)
}
  0x55   :  { %s292_s15 = scalar_lea.hbm %s435_s4, 256 }
  0x56   :  { %p293_p9 = scmp.ne.s32.totalorder %s435_s4, %s292_s15  ;;  %p296_p10 = scmp.lt.u32.totalorder %s292_s15, %s435_s4 }
  0x58   :  { %p298_p11 = pnand %p296_p10, %p293_p9 }
  0x5a   :  { %301 = shalt.err (!%p298_p11)
}
  0x5b   :  { %168 = dma.vmem_to_hbm [thread:$0]  %s163_s12, 256, %s435_s4, [#allocation4], %s312_s27, %s312_s27, %s313_s28  }
  0x5c   :  { %308 = dma.done.wait [#allocation4], 256  }
  0x5d   :  { %309 = vsyncadd [#allocation4], 4294967040 }
  0x5e   :  { %172 = vsyncpa [#allocation3], 1 }
  0x5f   :  { %173 = vsyncpa [#allocation6], 1 }
  0x60   :  { %174 = vsyncpa [#allocation9], 1 }
  0x61   :  { %175 = vsyncpa [#allocation4], 1 }

</bundles_post_ra>
